<compile_context>
chip_gen: v7x
topology: tpu7x:2x2x1
jax: 0.10.0
libtpu: 0.0.40
codegen_flags: <defaults>
</compile_context>

<pallas_src>
import jax
import jax.numpy as jnp
from jax.experimental import pallas as pl
from jax.experimental.pallas import tpu as pltpu


def _repeat_kernel(x_ref, o_ref):
    # x_ref: (bs, TR, L)    o_ref: (bs, TD, TR, L)
    x = x_ref[...]
    o_ref[...] = jnp.broadcast_to(x[:, None, :, :], o_ref.shape)


def _pick_tiles(bs, R, depth, itemsize):
    """Choose (TR, TD) so blocks land in the 2-4 MiB range and respect
    dtype-dependent sublane packing."""
    L = 128
    sublane_min = {1: 32, 2: 16}.get(itemsize, 8)
    row_bytes = bs * L * itemsize          # bytes per sublane-row of a block
    in_target = 2 * 1024 * 1024            # ~2 MiB input block
    out_target = 3 * 1024 * 1024           # ~3 MiB output block

    tr = max(1, in_target // row_bytes)
    if tr >= R:
        TR = R                              # full axis: always a legal block dim
    else:
        TR = max(sublane_min, (tr // sublane_min) * sublane_min)
        TR = min(TR, R)                     # either multiple of sublane_min or == R

    in_block_bytes = bs * TR * L * itemsize
    TD = int(max(1, min(depth, out_target // in_block_bytes)))
    return TR, TD, in_block_bytes


def repeat_conv_forward(x, depth):
    """x: (bs, C, D, H, W) -> (bs, depth, C, D, H, W) with out[:, t] == x."""
    bs = int(x.shape[0])
    feat_shape = x.shape[1:]
    F = 1
    for d in feat_shape:
        F *= int(d)

    itemsize = jnp.dtype(x.dtype).itemsize
    L = 128
    F_pad = ((F + L - 1) // L) * L
    R = F_pad // L

    x_flat = x.reshape(bs, F)
    if F_pad != F:
        # Pad the flattened features up to a lane multiple so all kernel stores
        # stay unmasked; the (small) pad/slice copies only hit the uncommon path.
        x_flat = jnp.pad(x_flat, ((0, 0), (0, F_pad - F)))
    x3 = x_flat.reshape(bs, R, L)

    TR, TD, in_block_bytes = _pick_tiles(bs, R, depth, itemsize)
    out_block_bytes = TD * in_block_bytes

    n_r = pl.cdiv(R, TR)
    n_t = pl.cdiv(depth, TD)

    # Double-buffered in + out blocks, plus headroom; clamp inside every
    # generation's physical VMEM (v7x: 64 MiB).
    vmem_limit = 2 * (in_block_bytes + out_block_bytes) + (4 << 20)
    vmem_limit = int(min(max(vmem_limit, 16 << 20), 64 << 20))

    out = pl.pallas_call(
        _repeat_kernel,
        out_shape=jax.ShapeDtypeStruct((bs, depth, R, L), x.dtype),
        grid=(n_r, n_t),  # depth innermost -> input tile stays VMEM-resident
        in_specs=[pl.BlockSpec((bs, TR, L), lambda r, t: (0, r, 0))],
        out_specs=pl.BlockSpec((bs, TD, TR, L), lambda r, t: (0, t, r, 0)),
        compiler_params=pltpu.CompilerParams(
            dimension_semantics=("parallel", "parallel"),
            vmem_limit_bytes=vmem_limit,
        ),
        cost_estimate=pl.CostEstimate(
            flops=0,
            transcendentals=0,
            bytes_accessed=int((1 + depth) * bs * F * itemsize),
        ),
    )(x3)

    if F_pad != F:
        out = out.reshape(bs, depth, F_pad)[:, :, :F]
    return out.reshape((bs, depth) + tuple(feat_shape))


if __name__ == "__main__":
    key = jax.random.PRNGKey(0)

    # Case 1: lane-aligned feature count (F = 4*8*8*8 = 2048 = 16*128).
    bs, C, D, H, W = 2, 4, 8, 8, 8
    depth = 3
    x = jax.random.normal(key, (bs, C, D, H, W), jnp.float32)
    out = jax.block_until_ready(repeat_conv_forward(x, depth))
    ref = jnp.broadcast_to(x[:, None], (bs, depth, C, D, H, W))
    assert out.shape == (bs, depth, C, D, H, W), out.shape
    assert float(jnp.max(jnp.abs(out - ref))) == 0.0

    # Case 2: non-multiple-of-128 feature count exercises the padded path.
    bs2, C2, D2, H2, W2 = 2, 3, 5, 7, 6   # F = 630
    depth2 = 4
    x2 = jax.random.normal(jax.random.PRNGKey(1), (bs2, C2, D2, H2, W2), jnp.float32)
    out2 = jax.block_until_ready(repeat_conv_forward(x2, depth2))
    ref2 = jnp.broadcast_to(x2[:, None], (bs2, depth2, C2, D2, H2, W2))
    assert out2.shape == (bs2, depth2, C2, D2, H2, W2), out2.shape
    assert float(jnp.max(jnp.abs(out2 - ref2))) == 0.0

    print("KERNEL_OK")
</pallas_src>

<mosaic_0001>
module attributes {stable_mosaic.version = 11 : i64} {
  func.func @_repeat_kernel(%arg0: i32, %arg1: i32, %arg2: memref<2x16x128xf32, #tpu.memory_space<vmem>>, %arg3: memref<2x3x16x128xf32, #tpu.memory_space<vmem>>) attributes {dimension_semantics = [#tpu.dimension_semantics<parallel>, #tpu.dimension_semantics<parallel>], iteration_bounds = array<i64: 1, 1>, scalar_prefetch = 0 : i64, scratch_operands = 0 : i64, tpu.core_type = #tpu.core_type<tc>, window_params = [{transform_indices = @transform_0, window_bounds = array<i64: 2, 16, 128>}, {transform_indices = @transform_1, window_bounds = array<i64: 2, 3, 16, 128>}]} {
    %c0 = arith.constant 0 : index
    %c0_0 = arith.constant 0 : index
    %c0_1 = arith.constant 0 : index
    %0 = vector.load %arg2[%c0, %c0_0, %c0_1] : memref<2x16x128xf32, #tpu.memory_space<vmem>>, vector<2x16x128xf32>
    %1 = vector.shape_cast %0 : vector<2x16x128xf32> to vector<2x1x16x128xf32>
    %2 = vector.shape_cast %1 : vector<2x1x16x128xf32> to vector<2x1x16x128xf32>
    %3 = vector.broadcast %2 : vector<2x1x16x128xf32> to vector<2x3x16x128xf32>
    %c0_2 = arith.constant 0 : index
    %c0_3 = arith.constant 0 : index
    %c0_4 = arith.constant 0 : index
    %c0_5 = arith.constant 0 : index
    %4 = vector.load %arg3[%c0_2, %c0_3, %c0_4, %c0_5] : memref<2x3x16x128xf32, #tpu.memory_space<vmem>>, vector<2x3x16x128xf32>
    tpu.vector_store %arg3[%c0_2, %c0_3, %c0_4, %c0_5], %3 {strides = array<i32>} : memref<2x3x16x128xf32, #tpu.memory_space<vmem>>, vector<2x3x16x128xf32>,
    return
  }
  func.func @transform_0(%arg0: i32, %arg1: i32) -> (i32, i32, i32) {
    %c0_i32 = arith.constant 0 : i32
    %c0_i32_0 = arith.constant 0 : i32
    %c0_i32_1 = arith.constant 0 : i32
    return %c0_i32, %arg0, %c0_i32_0 : i32, i32, i32
  }
  func.func @transform_1(%arg0: i32, %arg1: i32) -> (i32, i32, i32, i32) {
    %c0_i32 = arith.constant 0 : i32
    %c0_i32_0 = arith.constant 0 : i32
    %c0_i32_1 = arith.constant 0 : i32
    return %c0_i32, %arg1, %arg0, %c0_i32_0 : i32, i32, i32, i32
  }
}

</mosaic_0001>

<bundles_post_ra>
// kernel: tpu_custom_call.1
= control target key start
LH: loop header
LB: loop body
LE: loop exit
PB: predicated region body
PF: predicated region fallthrough
CT: control target
= control target key end

     0   :  { %6 = vsyncpa [#allocation3], 0  ;;  %s159_s0 = inlined_call_operand.hbm [shape: f32[2,16,128], index: 0, kind: input, shape index: {}]   ;;  %s160_s1 = inlined_call_operand.hbm [shape: f32[2,3,16,128], index: 1, kind: output, shape index: {}]  }
   0x1   :  { %7 = vsyncpa [#allocation4], 0  ;;  %s108_s6 = smov [#allocation2]   ;;  %s60_s10 = scalar_lea.hbm %s159_s0, 512 }
   0x2   :  { %s13_s7 = sshll.u32 %s108_s6, 4  ;;  %p61_p0 = scmp.ne.s32.totalorder %s159_s0, %s60_s10  ;;  %s14_s7 = int_to_ptr.vmem [resolvable:$true] %s13_s7 }
   0x3   :  { %p64_p1 = scmp.lt.u32.totalorder %s60_s10, %s159_s0 }
   0x5   :  { %p66_p2 = pnand %p64_p1, %p61_p0 }
   0x7   :  { %69 = shalt.err (!%p66_p2)
}
   0x8   :  { %s70_s15 = scalar_lea.vmem %s14_s7, 512  ;;  %p75_p4 = scmp.lt.s32.totalorder %s14_s7, %s14_s7 }
   0x9   :  { %p71_p3 = scmp.ne.s32.totalorder %s14_s7, %s70_s15  ;;  %p76_p5 = scmp.lt.s32.totalorder %s70_s15, %s70_s15 }
   0xb   :  { %p77_p6 = por %p76_p5, %p75_p4 }
   0xd   :  { %p78_p7 = pnand %p77_p6, %p71_p3 }
   0xf   :  { %81 = shalt.err (!%p78_p7)
}
  0x10   :  { %s109_s16 = smov 128   ;;  %s110_s17 = smov 8  }
  0x11   :  { %19 = dma.hbm_to_vmem [thread:$0]  %s159_s0, 512, %s14_s7, [#allocation3], %s109_s16, %s109_s16, %s110_s17  }
  0x12   :  { %104 = dma.done.wait [#allocation3], 512  }
  0x13   :  { %105 = vsyncadd [#allocation3], 4294966784  ;;  %s111_s20 = smov [#allocation5]   ;;  %v23_v0 = vld [vmem:[#allocation2] sm:$0xff]  ;;  %v24_v1 = vld [vmem:[#allocation2 + $0x8] sm:$0xff] }
  0x14   :  { %s44_s21 = sshll.u32 %s111_s20, 4  ;;  %v25_v2 = vld [vmem:[#allocation2 + $0x10] sm:$0xff]  ;;  %27 = vst [vmem:[#allocation5] sm:$0xff] %v23_v0  ;;  %29 = vst [vmem:[#allocation5 + $0x10] sm:$0xff] %v23_v0  ;;  %v26_v3 = vld [vmem:[#allocation2 + $0x18] sm:$0xff]  ;;  %s137_s21 = int_to_ptr.vmem [resolvable:$true] %s44_s21 }
  0x15   :  { %31 = vst [vmem:[#allocation5 + $0x20] sm:$0xff] %v23_v0  ;;  %28 = vst [vmem:[#allocation5 + $0x8] sm:$0xff] %v24_v1  ;;  %s82_s0 = scalar_lea.vmem %s137_s21, 1536  ;;  %p87_p9 = scmp.lt.s32.totalorder %s137_s21, %s137_s21 }
  0x16   :  { %30 = vst [vmem:[#allocation5 + $0x18] sm:$0xff] %v24_v1  ;;  %32 = vst [vmem:[#allocation5 + $0x28] sm:$0xff] %v24_v1  ;;  %p83_p8 = scmp.ne.s32.totalorder %s137_s21, %s82_s0  ;;  %p88_p10 = scmp.lt.s32.totalorder %s82_s0, %s82_s0 }
  0x17   :  { %33 = vst [vmem:[#allocation5 + $0x30] sm:$0xff] %v25_v2  ;;  %35 = vst [vmem:[#allocation5 + $0x40] sm:$0xff] %v25_v2 }
  0x18   :  { %37 = vst [vmem:[#allocation5 + $0x50] sm:$0xff] %v25_v2  ;;  %34 = vst [vmem:[#allocation5 + $0x38] sm:$0xff] %v26_v3  ;;  %p89_p11 = por %p88_p10, %p87_p9 }
  0x19   :  { %36 = vst [vmem:[#allocation5 + $0x48] sm:$0xff] %v26_v3  ;;  %38 = vst [vmem:[#allocation5 + $0x58] sm:$0xff] %v26_v3 }
  0x1a   :  { %p90_p12 = pnand %p89_p11, %p83_p8 }
  0x1c   :  { %93 = shalt.err (!%p90_p12)
}
  0x1d   :  { %s94_s24 = scalar_lea.hbm %s160_s1, 1536 }
  0x1e   :  { %p95_p13 = scmp.ne.s32.totalorder %s160_s1, %s94_s24  ;;  %p98_p0 = scmp.lt.u32.totalorder %s94_s24, %s160_s1 }
  0x20   :  { %p100_p1 = pnand %p98_p0, %p95_p13 }
  0x22   :  { %103 = shalt.err (!%p100_p1)
}
  0x23   :  { %50 = dma.vmem_to_hbm [thread:$0]  %s137_s21, 1536, %s160_s1, [#allocation4], %s109_s16, %s109_s16, %s110_s17  }
  0x24   :  { %106 = dma.done.wait [#allocation4], 1536  }
  0x25   :  { %107 = vsyncadd [#allocation4], 4294965760 }
  0x26   :  { %54 = vsyncpa [#allocation3], 1 }
  0x27   :  { %55 = vsyncpa [#allocation4], 1 }

</bundles_post_ra>
